<compile_context>
chip_gen: v5e
topology: v5e:2x2
jax: 0.10.0
libtpu: 0.0.40
codegen_flags: <defaults>
</compile_context>

<pallas_src>
import jax
import jax.numpy as jnp
from jax import lax
from jax.experimental import pallas as pl
from jax.experimental.pallas import tpu as pltpu


def _head_kernel(x_ref, w_ref, b_ref, o_ref):
    # x_ref: [tb, K]   w_ref: [C, K]   b_ref: [1, C]   o_ref: [tb, C]
    acc = lax.dot_general(
        x_ref[...], w_ref[...],
        dimension_numbers=(((1,), (1,)), ((), ())),   # x @ W.T, f32 MXU accumulation
        preferred_element_type=jnp.float32,
    )
    o_ref[...] = (acc + b_ref[...]).astype(o_ref.dtype)


def hubert_classification_head(features, weight, bias, *, tb=512):
    """Forward of HubertClassificationHead: features @ weight.T + bias.

    features: [B, 1024] f32
    weight:   [C, 1024] f32   (PyTorch nn.Linear layout, used as-is — no pad/transpose)
    bias:     [C]       f32
    returns:  [B, C]    f32
    """
    B, K = features.shape
    C, K2 = weight.shape
    assert K == K2, "hidden dim mismatch"

    bias2d = bias.reshape(1, C)

    # --- batch tiling: sublane-aligned; K stays whole in-block (no reduction grid) ---
    Bpad8 = pl.cdiv(B, 8) * 8
    n_steps = pl.cdiv(Bpad8, tb)
    if n_steps < 2 and Bpad8 >= 16:
        # v7x has 2 TensorCores: make sure large batches give the parallel grid
        # at least 2 steps so both cores get work.  No effect at tiny B.
        n_steps = 2
    tb_eff = pl.cdiv(pl.cdiv(Bpad8, n_steps), 8) * 8
    Bpad = n_steps * tb_eff

    x = features
    if Bpad != B:
        x = jnp.pad(x, ((0, Bpad - B), (0, 0)))

    out = pl.pallas_call(
        _head_kernel,
        out_shape=jax.ShapeDtypeStruct((Bpad, C), features.dtype),
        grid_spec=pltpu.PrefetchScalarGridSpec(
            num_scalar_prefetch=0,
            grid=(n_steps,),
            in_specs=[
                pl.BlockSpec((tb_eff, K), lambda i: (i, 0)),  # x tile over batch
                pl.BlockSpec((C, K), lambda i: (0, 0)),       # W resident, native layout
                pl.BlockSpec((1, C), lambda i: (0, 0)),       # bias resident
            ],
            out_specs=pl.BlockSpec((tb_eff, C), lambda i: (i, 0)),
        ),
        compiler_params=pltpu.CompilerParams(
            dimension_semantics=("parallel",),
        ),
    )(x, weight, bias2d)

    return out[:B]


if __name__ == "__main__":
    B, HIDDEN, NUM_CLASS = 8, 1024, 4  # nn.Linear(1024, num_class)

    key = jax.random.PRNGKey(0)
    kx, kw, kb = jax.random.split(key, 3)

    features = jax.random.normal(kx, (B, HIDDEN), dtype=jnp.float32)
    weight = jax.random.normal(kw, (NUM_CLASS, HIDDEN), dtype=jnp.float32) * 0.02
    bias = jax.random.normal(kb, (NUM_CLASS,), dtype=jnp.float32) * 0.01

    out = hubert_classification_head(features, weight, bias)
    out = jax.block_until_ready(out)

    # Plain-JAX reference of the PyTorch forward.
    ref = features @ weight.T + bias[None, :]
    assert out.shape == (B, NUM_CLASS)
    assert jnp.allclose(out, ref, atol=1e-4, rtol=1e-4)

    print("KERNEL_OK")
</pallas_src>

<mosaic_0001>
module attributes {stable_mosaic.version = 11 : i64} {
  func.func @_head_kernel(%arg0: i32, %arg1: memref<8x1024xf32, #tpu.memory_space<vmem>>, %arg2: memref<4x1024xf32, #tpu.memory_space<vmem>>, %arg3: memref<1x4xf32, #tpu.memory_space<vmem>>, %arg4: memref<8x4xf32, #tpu.memory_space<vmem>>) attributes {dimension_semantics = [#tpu.dimension_semantics<parallel>], iteration_bounds = array<i64: 1>, scalar_prefetch = 0 : i64, scratch_operands = 0 : i64, tpu.core_type = #tpu.core_type<tc>, window_params = [{transform_indices = @transform_0, window_bounds = array<i64: 8, 1024>}, {pipeline_mode = #tpu.pipeline_mode<synchronous>, transform_indices = @transform_1, window_bounds = array<i64: 4, 1024>}, {pipeline_mode = #tpu.pipeline_mode<synchronous>, transform_indices = @transform_2, window_bounds = array<i64: 1, 4>}, {transform_indices = @transform_3, window_bounds = array<i64: 8, 4>}]} {
    %c0 = arith.constant 0 : index
    %c0_0 = arith.constant 0 : index
    %0 = vector.load %arg1[%c0, %c0_0] : memref<8x1024xf32, #tpu.memory_space<vmem>>, vector<8x1024xf32>
    %c0_1 = arith.constant 0 : index
    %c0_2 = arith.constant 0 : index
    %1 = vector.load %arg2[%c0_1, %c0_2] : memref<4x1024xf32, #tpu.memory_space<vmem>>, vector<4x1024xf32>
    %cst = arith.constant dense<0.000000e+00> : vector<8x4xf32>
    %2 = tpu.matmul %0, %1, %cst {dimension_numbers = #tpu.dot_dimension_numbers<[1], [1], [0], [0], [0, 0, 1, 0], [], []>} : vector<8x1024xf32>, vector<4x1024xf32>, vector<8x4xf32> -> vector<8x4xf32>
    %c0_3 = arith.constant 0 : index
    %c0_4 = arith.constant 0 : index
    %3 = vector.load %arg3[%c0_3, %c0_4] : memref<1x4xf32, #tpu.memory_space<vmem>>, vector<1x4xf32>
    %4 = vector.broadcast %3 : vector<1x4xf32> to vector<8x4xf32>
    %5 = arith.addf %2, %4 : vector<8x4xf32>
    %c0_5 = arith.constant 0 : index
    %c0_6 = arith.constant 0 : index
    %6 = vector.load %arg4[%c0_5, %c0_6] : memref<8x4xf32, #tpu.memory_space<vmem>>, vector<8x4xf32>
    tpu.vector_store %arg4[%c0_5, %c0_6], %5 {strides = array<i32>} : memref<8x4xf32, #tpu.memory_space<vmem>>, vector<8x4xf32>,
    return
  }
  func.func @transform_0(%arg0: i32) -> (i32, i32) {
    %c0_i32 = arith.constant 0 : i32
    %c0_i32_0 = arith.constant 0 : i32
    return %arg0, %c0_i32 : i32, i32
  }
  func.func @transform_1(%arg0: i32) -> (i32, i32) {
    %c0_i32 = arith.constant 0 : i32
    %c0_i32_0 = arith.constant 0 : i32
    %c0_i32_1 = arith.constant 0 : i32
    return %c0_i32, %c0_i32_0 : i32, i32
  }
  func.func @transform_2(%arg0: i32) -> (i32, i32) {
    %c0_i32 = arith.constant 0 : i32
    %c0_i32_0 = arith.constant 0 : i32
    %c0_i32_1 = arith.constant 0 : i32
    return %c0_i32, %c0_i32_0 : i32, i32
  }
  func.func @transform_3(%arg0: i32) -> (i32, i32) {
    %c0_i32 = arith.constant 0 : i32
    %c0_i32_0 = arith.constant 0 : i32
    return %arg0, %c0_i32 : i32, i32
  }
}

</mosaic_0001>

<bundles_post_ra>
// kernel: tpu_custom_call.1
= control target key start
LH: loop header
LB: loop body
LE: loop exit
PB: predicated region body
PF: predicated region fallthrough
CT: control target
= control target key end

     0   :  { %8 = vsyncpa [#allocation3], 0  ;;  %s342_s0 = inlined_call_operand.hbm [shape: f32[8,1024], index: 0, kind: input, shape index: {}]   ;;  %s343_s1 = inlined_call_operand.hbm [shape: f32[4,1024], index: 1, kind: input, shape index: {}]   ;;  %s344_s2 = inlined_call_operand.vmem [shape: f32[1,4], index: 2, kind: input, shape index: {}]   ;;  %s345_s3 = inlined_call_operand.vmem [shape: f32[8,4], index: 3, kind: output, shape index: {}]  }
   0x1   :  { %s15_s14 = sshll.u32 %s342_s0, 4  ;;  %s16_s14 = int_to_ptr.hbm [resolvable:$true] %s15_s14 }
   0x2   :  { %9 = vsyncpa [#allocation5], 0  ;;  %s308_s15 = smov [#allocation2]   ;;  %s26_s19 = sshll.u32 %s343_s1, 4  ;;  %s27_s19 = int_to_ptr.hbm [resolvable:$true] %s26_s19 }
   0x3   :  { %s17_s16 = sshll.u32 %s308_s15, 4  ;;  %s309_s20 = smov [#allocation4]   ;;  %s18_s16 = int_to_ptr.vmem [resolvable:$true] %s17_s16 }
   0x4   :  { %20 = dma.hbm_to_vmem [thread:$0]  %s16_s14, 1024, %s18_s16, [#allocation3]  }
   0x5   :  { %s28_s21 = sshll.u32 %s309_s20, 4  ;;  %s29_s21 = int_to_ptr.vmem [resolvable:$true] %s28_s21 }
   0x6   :  { %31 = dma.hbm_to_vmem [thread:$0]  %s27_s19, 512, %s29_s21, [#allocation5]  }
   0x7   :  { %304 = dma.done.wait [#allocation3], 1024  }
   0x8   :  { %305 = vsyncadd [#allocation3], 4294966272 }
   0x9   :  { %306 = dma.done.wait [#allocation5], 512  }
   0xa   :  { %307 = vsyncadd [#allocation5], 4294966784  ;;  %v51_v0 = vld [vmem:[#allocation4 + $0x8] sm:$0xff]  ;;  %v50_v1 = vld [vmem:[#allocation4] sm:$0xff]  ;;  %vm245_vm0 = vcmask 31744  }
   0xb   :  { %64 = vst [vmem:[#allocation1 + $0x10] ss:$2 sm:$0xff] %v51_v0  ;;  %v53_v2 = vld [vmem:[#allocation4 + $0x18] sm:$0xff]  ;;  %v52_v3 = vld [vmem:[#allocation4 + $0x10] sm:$0xff]  ;;  %v42_v8 = vld [vmem:[#allocation2] sm:$0xff] }
   0xc   :  { %62 = vst [vmem:[#allocation1] ss:$2 sm:$0xff] %v50_v1  ;;  %v44_v4 = vld [vmem:[#allocation2 + $0x10] sm:$0xff]  ;;  %v45_v5 = vld [vmem:[#allocation2 + $0x18] sm:$0xff]  ;;  %v43_v9 = vld [vmem:[#allocation2 + $0x8] sm:$0xff] }
   0xd   :  { %68 = vst [vmem:[#allocation1 + $0x30] ss:$2 sm:$0xff] %v53_v2  ;;  %v48_v16 = vld [vmem:[#allocation2 + $0x30] sm:$0xff]  ;;  %v49_v17 = vld [vmem:[#allocation2 + $0x38] sm:$0xff]  ;;  %v46_v18 = vld [vmem:[#allocation2 + $0x20] sm:$0xff] }
   0xe   :  { %66 = vst [vmem:[#allocation1 + $0x20] ss:$2 sm:$0xff] %v52_v3  ;;  %v47_v19 = vld [vmem:[#allocation2 + $0x28] sm:$0xff]  ;;  %v255_v20 = vld [vmem:[%s344_s2] ss:$0 sm:$0xff] }
  0x12   :  { %v71_v6 = vld.sshfl [vmem:[#allocation1 + $0x10] sm:$0xff pattern:$0x75316420]  ;;  %v72_v7 = vld.sshfl [vmem:[#allocation1 + $0x18] sm:$0xff pattern:$0x75316420] }
  0x13   :  { %140 = vmatpush.xpose.msra.mxu2 %v71_v6  ;;  %v69_v10 = vld.sshfl [vmem:[#allocation1] sm:$0xff pattern:$0x75316420]  ;;  %160 = vmatpush.xpose.msra.mxu3 %v72_v7  ;;  %v70_v11 = vld.sshfl [vmem:[#allocation1 + $0x8] sm:$0xff pattern:$0x75316420] }
  0x14   :  { %100 = vmatpush.xpose.msra.mxu0 %v69_v10  ;;  %v75_v12 = vld.sshfl [vmem:[#allocation1 + $0x30] sm:$0xff pattern:$0x75316420]  ;;  %120 = vmatpush.xpose.msra.mxu1 %v70_v11  ;;  %v76_v13 = vld.sshfl [vmem:[#allocation1 + $0x38] sm:$0xff pattern:$0x75316420] }
  0x15   :  { %v73_v14 = vld.sshfl [vmem:[#allocation1 + $0x20] sm:$0xff pattern:$0x75316420]  ;;  %v74_v15 = vld.sshfl [vmem:[#allocation1 + $0x28] sm:$0xff pattern:$0x75316420] }
  0x16   :  { %141 = vmatmul.f32.vlgmr.msra.gmra.mxu2 %v44_v4  ;;  %161 = vmatmul.f32.vlgmr.msra.gmra.mxu3 %v45_v5 }
  0x17   :  { %220 = vmatpush.xpose.msrb.mxu2 %v75_v12  ;;  %240 = vmatpush.xpose.msrb.mxu3 %v76_v13 }
  0x18   :  { %101 = vmatmul.f32.vlgmr.msra.gmra.mxu0 %v42_v8  ;;  %121 = vmatmul.f32.vlgmr.msra.gmra.mxu1 %v43_v9 }
  0x19   :  { %180 = vmatpush.xpose.msrb.mxu0 %v73_v14  ;;  %200 = vmatpush.xpose.msrb.mxu1 %v74_v15 }
  0x1e   :  { %221 = vmatmul.f32.vlgmr.msrb.gmra.mxu2 %v48_v16  ;;  %241 = vmatmul.f32.vlgmr.msrb.gmra.mxu3 %v49_v17 }
  0x20   :  { %181 = vmatmul.f32.vlgmr.msrb.gmra.mxu0 %v46_v18  ;;  %201 = vmatmul.f32.vlgmr.msrb.gmra.mxu1 %v47_v19 }
  0x95   :  { %v102_v21 = vpop.f32.mrf.mxu0  ;;  %v122_v22 = vpop.f32.mrf.mxu1 }
  0x96   :  { %v103_v23 = vadd.f32 %v255_v20, %v102_v21 }
  0x98   :  { %v123_v24 = vadd.f32 %v122_v22, %v103_v23 }
  0x99   :  { %v142_v25 = vpop.f32.mrf.mxu2  ;;  %v162_v26 = vpop.f32.mrf.mxu3 }
  0x9a   :  { %v143_v27 = vadd.f32 %v142_v25, %v123_v24 }
  0x9c   :  { %v163_v28 = vadd.f32 %v162_v26, %v143_v27 }
  0x9d   :  { %v182_v29 = vpop.f32.mrf.mxu0  ;;  %v202_v30 = vpop.f32.mrf.mxu1 }
  0x9e   :  { %v183_v31 = vadd.f32 %v182_v29, %v163_v28 }
  0xa0   :  { %v203_v32 = vadd.f32 %v202_v30, %v183_v31 }
  0xa1   :  { %v222_v33 = vpop.f32.mrf.mxu2  ;;  %v242_v34 = vpop.f32.mrf.mxu3 }
  0xa2   :  { %v223_v35 = vadd.f32 %v222_v33, %v203_v32 }
  0xa4   :  { %v243_v36 = vadd.f32 %v242_v34, %v223_v35 }
  0xa6   :  { %246 = vst.msk [vmem:[%s345_s3] sm:$0xff] %vm245_vm0, %v243_v36 }
  0xa7   :  { %251 = vsyncpa [#allocation3], 1 }
  0xa8   :  { %252 = vsyncpa [#allocation5], 1 }

</bundles_post_ra>
